<compile_context>
chip_gen: v6e
topology: v6e:2x2x1
jax: 0.10.0
libtpu: 0.0.40
codegen_flags: <defaults>
</compile_context>

<pallas_src>
import jax
import jax.numpy as jnp
from jax.experimental import pallas as pl
from jax.experimental.pallas import tpu as pltpu

# Problem dims implied by MyCNN (fc_input_size = 32*2*2  ->  input spatial H=2, W=8).
N, CIN, H, W = 2, 4, 2, 8
C1, C2 = 128, 32
W1P = W // 2             # width after pool1 = 4
W2P = W1P // 2           # width after pool2 (stride-2 subsample) = 2
F_IN = C2 * H * W2P      # 128 == fc_input_size
F1, F2, F3, F4 = 256, 128, 64, 1

K1 = 6 * CIN             # conv1 fused contraction: (real input row r, kw) pairs = 2*3
K2 = 6 * C1              # conv2 fused contraction

# bias / misc row offsets inside pack_a (rows 24..31)
_R_B1, _R_B2, _R_FB1, _R_FB2, _R_FB3, _R_FW4, _R_FB4 = 24, 25, 26, 27, 28, 29, 30


# ------------------------------- fused kernel -------------------------------

def _mycnn_kernel(x_ref,             # (N, H, W, CIN) f32   NHWC input              (VMEM, auto-DMA)
                  pa_ref,            # (32, 256) f32        conv1 weights + biases  (VMEM, auto-DMA)
                  w2_hbm,            # (K2, 2*C2) bf16      conv2 weights           (pl.ANY / HBM)
                  fw1_hbm,           # (F_IN, F1) bf16      fc1 weights             (pl.ANY / HBM)
                  fc23_hbm,          # (F1+F2, F2) bf16     fc2 + fc3(padded)       (pl.ANY / HBM)
                  o_ref,             # (N, 1) f32
                  w2_vmem, fw1_vmem, fc23_vmem,   # VMEM landing buffers for the manual DMAs
                  sem):              # DMA semaphores, shape (3,)
    f32, bf16 = jnp.float32, jnp.bfloat16
    relu = lambda v: jnp.maximum(v, 0.0)
    # Explicit precision decision: bf16 operands, f32 accumulation (single MXU pass).
    mm = lambda a, b: jnp.dot(a.astype(bf16), b, preferred_element_type=f32)

    # Kick off the big weight copies now; they stream in behind the conv compute.
    cp_w2 = pltpu.make_async_copy(w2_hbm, w2_vmem, sem.at[0])
    cp_fw1 = pltpu.make_async_copy(fw1_hbm, fw1_vmem, sem.at[1])
    cp_fc23 = pltpu.make_async_copy(fc23_hbm, fc23_vmem, sem.at[2])
    cp_w2.start()
    cp_fw1.start()
    cp_fc23.start()

    # ---- conv1 (3x3, pad=1) as ONE matmul, taps fused along K --------------------------------
    # D1 row (n*W + w), col (kw*2*CIN + r*CIN + cin) = x[n, cin, r, w+kw-1]   (0 if width OOB).
    # The all-zero padding-row taps are never materialized; the h=0 / h=1 tap selection lives in
    # the two 128-lane halves of the conv1 weight block (pack_a rows 0:24).
    zrow_in = jnp.zeros((1, 2 * CIN), f32)
    d1_parts = []
    for n in range(N):
        xr = jnp.concatenate([x_ref[n, 0], x_ref[n, 1]], axis=-1)          # (W, 2*CIN)
        xrp = jnp.concatenate([zrow_in, xr, zrow_in], axis=0)              # (W+2, 2*CIN)
        d1_parts.append(jnp.concatenate(
            [xrp[0:W], xrp[1:W + 1], xrp[2:W + 2]], axis=-1))              # (W, K1)
    d1 = jnp.concatenate(d1_parts, axis=0)                                 # (N*W, K1)

    w1 = pa_ref[0:24, :].astype(bf16)                                      # (K1, 2*C1)
    y1 = relu(mm(d1, w1) + pa_ref[_R_B1:_R_B1 + 1, :])                     # (N*W, 2*C1), col = h*C1+c

    # ---- pool1 ((1,2)/(1,2)) in vregs + conv2 im2col, taps fused along K ----------------------
    zrow_c1 = jnp.zeros((1, 2 * C1), f32)
    d2_parts = []
    for n in range(N):
        blk = y1[n * W:(n + 1) * W, :]                                     # (W, 2*C1)
        pooled = jnp.concatenate(
            [jnp.maximum(blk[2 * j:2 * j + 1, :], blk[2 * j + 1:2 * j + 2, :])
             for j in range(W1P)], axis=0)                                 # (W1P, 2*C1)
        pp = jnp.concatenate([zrow_c1, pooled, zrow_c1], axis=0)           # (W1P+2, 2*C1)
        d2_parts.append(jnp.concatenate(
            [pp[0:W1P], pp[1:W1P + 1], pp[2:W1P + 2]], axis=-1))           # (W1P, K2) full-128 slabs
    d2 = jnp.concatenate(d2_parts, axis=0)                                 # (N*W1P, K2)

    cp_w2.wait()                                                           # conv2 weights landed
    y2 = relu(mm(d2, w2_vmem[...]) + pa_ref[_R_B2:_R_B2 + 1, 0:2 * C2])    # (N*W1P, 2*C2), col = h*C2+c

    # ---- pool2 ((1,1)/(1,2)) + NCHW flatten -> (N, F_IN), then FC trunk batched over N --------
    feats = []
    for n in range(N):
        feats.append(jnp.concatenate(
            [y2[n * W1P + 0:n * W1P + 1, :],                               # surviving width col 0
             y2[n * W1P + 2:n * W1P + 3, :]], axis=-1))                    # surviving width col 2
    xf = jnp.concatenate(feats, axis=0)                                    # (N, F_IN), col = wp*64+h*32+c

    cp_fw1.wait()
    xf = relu(mm(xf, fw1_vmem[...]) + pa_ref[_R_FB1:_R_FB1 + 1, :])        # fc1 + relu3      (N, F1)
    cp_fc23.wait()
    xf = relu(mm(xf, fc23_vmem[0:F1, :])                                   # fc2 + "sigmoid" (= nn.ReLU())
              + pa_ref[_R_FB2:_R_FB2 + 1, 0:F2])                           # (N, F2)
    xf = relu(mm(xf, fc23_vmem[F1:F1 + F2, :])                             # fc3 + relu4; lanes F3..F2
              + pa_ref[_R_FB3:_R_FB3 + 1, 0:F2])                           # stay exactly 0 (zero pad)
    # fc4: single output feature -> VPU multiply + lane reduction (padded lanes carry zero weight).
    out = (jnp.sum(xf * pa_ref[_R_FW4:_R_FW4 + 1, 0:F2], axis=-1, keepdims=True)
           + pa_ref[_R_FB4:_R_FB4 + 1, 0:1])
    o_ref[...] = out.astype(o_ref.dtype)


# ------------------------------ host-side wrapper ------------------------------

@jax.jit
def mycnn_forward(x_nchw, kp):
    # x.double().float() in the PyTorch forward is a float32 no-op; NCHW -> NHWC puts channels
    # on the TPU lane axis.
    x_nhwc = jnp.transpose(x_nchw.astype(jnp.float32), (0, 2, 3, 1))       # (N, H, W, CIN)
    vmem = pl.BlockSpec(memory_space=pltpu.MemorySpace.VMEM)
    hbm = pl.BlockSpec(memory_space=pl.ANY)                                # copied in-kernel (overlap)
    return pl.pallas_call(
        _mycnn_kernel,
        out_shape=jax.ShapeDtypeStruct((N, F4), jnp.float32),
        in_specs=[vmem, vmem, hbm, hbm, hbm],
        out_specs=vmem,
        scratch_shapes=[
            pltpu.VMEM((K2, 2 * C2), jnp.bfloat16),     # conv2 weight landing buffer
            pltpu.VMEM((F_IN, F1), jnp.bfloat16),       # fc1 weight landing buffer
            pltpu.VMEM((F1 + F2, F2), jnp.bfloat16),    # fc2 + fc3 weight landing buffer
            pltpu.SemaphoreType.DMA((3,)),
        ],
        # Grid-less on purpose: footprint <1 MiB and N=2.  TODO(synk): if batch grows, add
        # grid=(N,) with dimension_semantics=("parallel",) to use both v7x TensorCores.
    )(x_nhwc, kp["pack_a"], kp["w2"], kp["fw1"], kp["fc23"])


def init_params(key):
    """Deterministic synthetic parameters in native PyTorch layout:
    Conv2d weight (Cout, Cin, kh, kw); Linear weight (out, in)."""
    ks = jax.random.split(key, 12)
    r = lambda k, shape, s: jax.random.normal(k, shape, jnp.float32) * s
    return {
        "conv1_w": r(ks[0], (C1, CIN, 3, 3), 0.10), "conv1_b": r(ks[1], (C1,), 0.10),
        "conv2_w": r(ks[2], (C2, C1, 3, 3), 0.05),  "conv2_b": r(ks[3], (C2,), 0.05),
        "fc1_w": r(ks[4], (F1, F_IN), 0.05), "fc1_b": r(ks[5], (F1,), 0.05),
        "fc2_w": r(ks[6], (F2, F1), 0.05),   "fc2_b": r(ks[7], (F2,), 0.05),
        "fc3_w": r(ks[8], (F3, F2), 0.05),   "fc3_b": r(ks[9], (F3,), 0.05),
        "fc4_w": r(ks[10], (F4, F3), 0.05),  "fc4_b": r(ks[11], (F4,), 0.05),
    }


def prepare_params(p):
    """One-time host repack: PyTorch layouts -> kernel layouts.

    pack_a (f32, 32x256): rows 0:24 = conv1 weights in fused-K layout
        (row kw*2*CIN + r*CIN + cin, col h*C1 + cout) = conv1_w[cout, cin, kh=r-h+1, kw];
        rows 24:31 = bias/misc rows (b1|b1, b2|b2, fb1, fb2, fb3(pad), fc4_w(pad), fc4_b).
    w2   (bf16, 768x64):  conv2 weights, fused-K layout (kw*2*C1 + r*C1 + cin, h*C2 + cout).
    fw1  (bf16, 128x256): fc1 weights with the PyTorch NCHW flatten folded in
        (kernel feature index wp*64 + h*32 + cout  <->  torch index cout*4 + h*2 + wp).
    fc23 (bf16, 384x128): fc2^T stacked on fc3^T (fc3 zero-padded to 128 output lanes).
    """
    f32, bf16 = jnp.float32, jnp.bfloat16
    c1w = p["conv1_w"].astype(f32)                         # (C1, CIN, 3, 3)
    c2w = p["conv2_w"].astype(f32)                         # (C2, C1, 3, 3)

    w1b = jnp.zeros((K1, 2 * C1), f32)
    w2b = jnp.zeros((K2, 2 * C2), f32)
    for h in range(H):
        for r in range(H):                                 # real input rows only -> static halo skip
            kh = r - h + 1
            for kw in range(3):
                w1b = w1b.at[kw * 2 * CIN + r * CIN: kw * 2 * CIN + (r + 1) * CIN,
                             h * C1:(h + 1) * C1].set(c1w[:, :, kh, kw].T)
                w2b = w2b.at[kw * 2 * C1 + r * C1: kw * 2 * C1 + (r + 1) * C1,
                             h * C2:(h + 1) * C2].set(c2w[:, :, kh, kw].T)

    f1w = p["fc1_w"].astype(f32)                           # (F1, F_IN), torch col = cout*4 + h*2 + wp
    fw1 = jnp.zeros((F_IN, F1), f32)
    for wp in range(W2P):
        for h in range(H):
            cols = jnp.arange(C2) * (H * W2P) + h * W2P + wp
            fw1 = fw1.at[wp * (H * C2) + h * C2: wp * (H * C2) + (h + 1) * C2, :].set(f1w[:, cols].T)

    fw3p = jnp.zeros((F2, F2), f32).at[:, :F3].set(p["fc3_w"].astype(f32).T)
    fc23 = jnp.concatenate([p["fc2_w"].astype(f32).T, fw3p], axis=0)       # (F1+F2, F2)

    def pad_row(v, width):
        return jnp.zeros((2 * C1,), f32).at[:width].set(jnp.asarray(v, f32).reshape(-1))

    bias_rows = jnp.stack([
        jnp.concatenate([p["conv1_b"], p["conv1_b"]]).astype(f32),         # b1 | b1   (256)
        pad_row(jnp.concatenate([p["conv2_b"], p["conv2_b"]]), 2 * C2),    # b2 | b2
        p["fc1_b"].astype(f32),                                            # fb1       (256)
        pad_row(p["fc2_b"], F2),                                           # fb2
        pad_row(p["fc3_b"], F3),                                           # fb3 (padded lanes stay 0)
        pad_row(p["fc4_w"].reshape(-1), F3),                               # fc4 weight row (padded)
        pad_row(p["fc4_b"], 1),                                            # fc4 bias
        jnp.zeros((2 * C1,), f32),
    ], axis=0)                                                             # (8, 256)

    return {
        "pack_a": jnp.concatenate([w1b, bias_rows], axis=0),               # (32, 256) f32
        "w2": w2b.astype(bf16),
        "fw1": fw1.astype(bf16),
        "fc23": fc23.astype(bf16),
    }


def _reference_forward(x_nchw, p):
    """Pure-JAX/XLA reference with the exact MyCNN semantics (validation only)."""
    f32 = jnp.float32
    with jax.default_matmul_precision("highest"):
        x = x_nchw.astype(f32)                                             # .double().float() no-op

        def conv3x3(x, w, b):
            y = jax.lax.conv_general_dilated(
                x, w.astype(f32), window_strides=(1, 1), padding=((1, 1), (1, 1)),
                dimension_numbers=("NCHW", "OIHW", "NCHW"))
            return y + b.astype(f32)[None, :, None, None]

        x = jax.nn.relu(conv3x3(x, p["conv1_w"], p["conv1_b"]))
        x = jnp.maximum(x[:, :, :, 0::2], x[:, :, :, 1::2])                # MaxPool2d((1,2),(1,2))
        x = jax.nn.relu(conv3x3(x, p["conv2_w"], p["conv2_b"]))
        x = x[:, :, :, 0::2]                                               # MaxPool2d((1,1),(1,2))
        x = x.reshape(x.shape[0], -1)                                      # torch .view(N, -1) (NCHW)
        x = jax.nn.relu(jnp.dot(x, p["fc1_w"].astype(f32).T) + p["fc1_b"])
        x = jax.nn.relu(jnp.dot(x, p["fc2_w"].astype(f32).T) + p["fc2_b"])  # sigmoid attr = ReLU
        x = jax.nn.relu(jnp.dot(x, p["fc3_w"].astype(f32).T) + p["fc3_b"])
        return jnp.dot(x, p["fc4_w"].astype(f32).T) + p["fc4_b"]


if __name__ == "__main__":
    key = jax.random.PRNGKey(0)
    k_x, k_p = jax.random.split(key)

    # Input shape implied by fc_input_size = 32*2*2: (batch=2, C=4, H=2, W=8).
    x = jax.random.normal(k_x, (N, CIN, H, W), jnp.float32)
    params = init_params(k_p)             # PyTorch-layout weights
    kparams = prepare_params(params)      # kernel-layout weights (one-time repack)

    out = mycnn_forward(x, kparams)
    jax.block_until_ready(out)
    assert out.shape == (N, F4) and out.dtype == jnp.float32, (out.shape, out.dtype)

    ref = _reference_forward(x, params)
    assert jnp.allclose(out, ref, atol=1e-2, rtol=1e-2), (out, ref)
    print("KERNEL_OK")
</pallas_src>

<mosaic_0001>
module attributes {stable_mosaic.version = 11 : i64} {
  func.func @_mycnn_kernel(%arg0: memref<2x2x8x4xf32, #tpu.memory_space<vmem>>, %arg1: memref<32x256xf32, #tpu.memory_space<vmem>>, %arg2: memref<768x64xbf16, #tpu.memory_space<any>>, %arg3: memref<128x256xbf16, #tpu.memory_space<any>>, %arg4: memref<384x128xbf16, #tpu.memory_space<any>>, %arg5: memref<2x1xf32, #tpu.memory_space<vmem>>, %arg6: memref<768x64xbf16, #tpu.memory_space<vmem>>, %arg7: memref<128x256xbf16, #tpu.memory_space<vmem>>, %arg8: memref<384x128xbf16, #tpu.memory_space<vmem>>, %arg9: memref<3x!tpu.dma_semaphore, #tpu.memory_space<semaphore_mem>>) attributes {dimension_semantics = [], scalar_prefetch = 0 : i64, scratch_operands = 4 : i64, tpu.core_type = #tpu.core_type<tc>} {
    %c0_i32 = arith.constant 0 : i32
    %0 = tpu.memref_slice %arg9[%c0_i32] : memref<3x!tpu.dma_semaphore, #tpu.memory_space<semaphore_mem>> -> memref<1x!tpu.dma_semaphore, #tpu.memory_space<semaphore_mem>>
    %1 = tpu.memref_squeeze %0 : memref<1x!tpu.dma_semaphore, #tpu.memory_space<semaphore_mem>> -> memref<!tpu.dma_semaphore, #tpu.memory_space<semaphore_mem>>
    tpu.enqueue_dma source(%arg2 : memref<768x64xbf16, #tpu.memory_space<any>>) target(%arg6 : memref<768x64xbf16, #tpu.memory_space<vmem>>) target_semaphore(%1 : memref<!tpu.dma_semaphore, #tpu.memory_space<semaphore_mem>>)
    %c1_i32 = arith.constant 1 : i32
    %2 = tpu.memref_slice %arg9[%c1_i32] : memref<3x!tpu.dma_semaphore, #tpu.memory_space<semaphore_mem>> -> memref<1x!tpu.dma_semaphore, #tpu.memory_space<semaphore_mem>>
    %3 = tpu.memref_squeeze %2 : memref<1x!tpu.dma_semaphore, #tpu.memory_space<semaphore_mem>> -> memref<!tpu.dma_semaphore, #tpu.memory_space<semaphore_mem>>
    tpu.enqueue_dma source(%arg3 : memref<128x256xbf16, #tpu.memory_space<any>>) target(%arg7 : memref<128x256xbf16, #tpu.memory_space<vmem>>) target_semaphore(%3 : memref<!tpu.dma_semaphore, #tpu.memory_space<semaphore_mem>>)
    %c2_i32 = arith.constant 2 : i32
    %4 = tpu.memref_slice %arg9[%c2_i32] : memref<3x!tpu.dma_semaphore, #tpu.memory_space<semaphore_mem>> -> memref<1x!tpu.dma_semaphore, #tpu.memory_space<semaphore_mem>>
    %5 = tpu.memref_squeeze %4 : memref<1x!tpu.dma_semaphore, #tpu.memory_space<semaphore_mem>> -> memref<!tpu.dma_semaphore, #tpu.memory_space<semaphore_mem>>
    tpu.enqueue_dma source(%arg4 : memref<384x128xbf16, #tpu.memory_space<any>>) target(%arg8 : memref<384x128xbf16, #tpu.memory_space<vmem>>) target_semaphore(%5 : memref<!tpu.dma_semaphore, #tpu.memory_space<semaphore_mem>>)
    %cst = arith.constant 0.000000e+00 : f32
    %6 = vector.broadcast %cst : f32 to vector<1x8xf32>
    %c0 = arith.constant 0 : index
    %c0_0 = arith.constant 0 : index
    %c0_1 = arith.constant 0 : index
    %c0_2 = arith.constant 0 : index
    %7 = vector.load %arg0[%c0, %c0_0, %c0_1, %c0_2] : memref<2x2x8x4xf32, #tpu.memory_space<vmem>>, vector<1x1x8x4xf32>
    %8 = vector.shape_cast %7 : vector<1x1x8x4xf32> to vector<8x4xf32>
    %c0_3 = arith.constant 0 : index
    %c1 = arith.constant 1 : index
    %c0_4 = arith.constant 0 : index
    %c0_5 = arith.constant 0 : index
    %9 = vector.load %arg0[%c0_3, %c1, %c0_4, %c0_5] : memref<2x2x8x4xf32, #tpu.memory_space<vmem>>, vector<1x1x8x4xf32>
    %10 = vector.shape_cast %9 : vector<1x1x8x4xf32> to vector<8x4xf32>
    %11 = tpu.concatenate %8, %10 in 1 : vector<8x4xf32>, vector<8x4xf32> -> vector<8x8xf32>
    %12 = tpu.concatenate %6, %11, %6 in 0 : vector<1x8xf32>, vector<8x8xf32>, vector<1x8xf32> -> vector<10x8xf32>
    %13 = vector.extract_strided_slice %12 {offsets = [0, 0], sizes = [8, 8], strides = [1, 1]} : vector<10x8xf32> to vector<8x8xf32>
    %14 = vector.extract_strided_slice %12 {offsets = [1, 0], sizes = [8, 8], strides = [1, 1]} : vector<10x8xf32> to vector<8x8xf32>
    %15 = vector.extract_strided_slice %12 {offsets = [2, 0], sizes = [8, 8], strides = [1, 1]} : vector<10x8xf32> to vector<8x8xf32>
    %16 = tpu.concatenate %13, %14, %15 in 1 : vector<8x8xf32>, vector<8x8xf32>, vector<8x8xf32> -> vector<8x24xf32>
    %c1_6 = arith.constant 1 : index
    %c0_7 = arith.constant 0 : index
    %c0_8 = arith.constant 0 : index
    %c0_9 = arith.constant 0 : index
    %17 = vector.load %arg0[%c1_6, %c0_7, %c0_8, %c0_9] : memref<2x2x8x4xf32, #tpu.memory_space<vmem>>, vector<1x1x8x4xf32>
    %18 = vector.shape_cast %17 : vector<1x1x8x4xf32> to vector<8x4xf32>
    %c1_10 = arith.constant 1 : index
    %c1_11 = arith.constant 1 : index
    %c0_12 = arith.constant 0 : index
    %c0_13 = arith.constant 0 : index
    %19 = vector.load %arg0[%c1_10, %c1_11, %c0_12, %c0_13] : memref<2x2x8x4xf32, #tpu.memory_space<vmem>>, vector<1x1x8x4xf32>
    %20 = vector.shape_cast %19 : vector<1x1x8x4xf32> to vector<8x4xf32>
    %21 = tpu.concatenate %18, %20 in 1 : vector<8x4xf32>, vector<8x4xf32> -> vector<8x8xf32>
    %22 = tpu.concatenate %6, %21, %6 in 0 : vector<1x8xf32>, vector<8x8xf32>, vector<1x8xf32> -> vector<10x8xf32>
    %23 = vector.extract_strided_slice %22 {offsets = [0, 0], sizes = [8, 8], strides = [1, 1]} : vector<10x8xf32> to vector<8x8xf32>
    %24 = vector.extract_strided_slice %22 {offsets = [1, 0], sizes = [8, 8], strides = [1, 1]} : vector<10x8xf32> to vector<8x8xf32>
    %25 = vector.extract_strided_slice %22 {offsets = [2, 0], sizes = [8, 8], strides = [1, 1]} : vector<10x8xf32> to vector<8x8xf32>
    %26 = tpu.concatenate %23, %24, %25 in 1 : vector<8x8xf32>, vector<8x8xf32>, vector<8x8xf32> -> vector<8x24xf32>
    %27 = tpu.concatenate %16, %26 in 0 : vector<8x24xf32>, vector<8x24xf32> -> vector<16x24xf32>
    %c0_14 = arith.constant 0 : index
    %c0_15 = arith.constant 0 : index
    %28 = vector.load %arg1[%c0_14, %c0_15] : memref<32x256xf32, #tpu.memory_space<vmem>>, vector<24x256xf32>
    %29 = arith.truncf %28 : vector<24x256xf32> to vector<24x256xbf16>
    %30 = arith.truncf %27 : vector<16x24xf32> to vector<16x24xbf16>
    %cst_16 = arith.constant dense<0.000000e+00> : vector<16x256xf32>
    %31 = tpu.matmul %30, %29, %cst_16 {dimension_numbers = #tpu.dot_dimension_numbers<[1], [0], [0], [1], [0, 0, 1, 1], [], []>} : vector<16x24xbf16>, vector<24x256xbf16>, vector<16x256xf32> -> vector<16x256xf32>
    %c24 = arith.constant 24 : index
    %c0_17 = arith.constant 0 : index
    %32 = vector.load %arg1[%c24, %c0_17] : memref<32x256xf32, #tpu.memory_space<vmem>>, vector<1x256xf32>
    %33 = vector.broadcast %32 : vector<1x256xf32> to vector<16x256xf32>
    %34 = arith.addf %31, %33 : vector<16x256xf32>
    %cst_18 = arith.constant 0.000000e+00 : f32
    %35 = vector.broadcast %cst_18 : f32 to vector<16x256xf32>
    %36 = arith.maximumf %34, %35 : vector<16x256xf32>
    %cst_19 = arith.constant 0.000000e+00 : f32
    %37 = vector.broadcast %cst_19 : f32 to vector<1x256xf32>
    %38 = vector.extract_strided_slice %36 {offsets = [0, 0], sizes = [8, 256], strides = [1, 1]} : vector<16x256xf32> to vector<8x256xf32>
    %39 = vector.extract_strided_slice %38 {offsets = [0, 0], sizes = [1, 256], strides = [1, 1]} : vector<8x256xf32> to vector<1x256xf32>
    %40 = vector.extract_strided_slice %38 {offsets = [1, 0], sizes = [1, 256], strides = [1, 1]} : vector<8x256xf32> to vector<1x256xf32>
    %41 = arith.maximumf %39, %40 : vector<1x256xf32>
    %42 = vector.extract_strided_slice %38 {offsets = [2, 0], sizes = [1, 256], strides = [1, 1]} : vector<8x256xf32> to vector<1x256xf32>
    %43 = vector.extract_strided_slice %38 {offsets = [3, 0], sizes = [1, 256], strides = [1, 1]} : vector<8x256xf32> to vector<1x256xf32>
    %44 = arith.maximumf %42, %43 : vector<1x256xf32>
    %45 = vector.extract_strided_slice %38 {offsets = [4, 0], sizes = [1, 256], strides = [1, 1]} : vector<8x256xf32> to vector<1x256xf32>
    %46 = vector.extract_strided_slice %38 {offsets = [5, 0], sizes = [1, 256], strides = [1, 1]} : vector<8x256xf32> to vector<1x256xf32>
    %47 = arith.maximumf %45, %46 : vector<1x256xf32>
    %48 = vector.extract_strided_slice %38 {offsets = [6, 0], sizes = [1, 256], strides = [1, 1]} : vector<8x256xf32> to vector<1x256xf32>
    %49 = vector.extract_strided_slice %38 {offsets = [7, 0], sizes = [1, 256], strides = [1, 1]} : vector<8x256xf32> to vector<1x256xf32>
    %50 = arith.maximumf %48, %49 : vector<1x256xf32>
    %51 = tpu.concatenate %41, %44, %47, %50 in 0 : vector<1x256xf32>, vector<1x256xf32>, vector<1x256xf32>, vector<1x256xf32> -> vector<4x256xf32>
    %52 = tpu.concatenate %37, %51, %37 in 0 : vector<1x256xf32>, vector<4x256xf32>, vector<1x256xf32> -> vector<6x256xf32>
    %53 = vector.extract_strided_slice %52 {offsets = [0, 0], sizes = [4, 256], strides = [1, 1]} : vector<6x256xf32> to vector<4x256xf32>
    %54 = vector.extract_strided_slice %52 {offsets = [1, 0], sizes = [4, 256], strides = [1, 1]} : vector<6x256xf32> to vector<4x256xf32>
    %55 = vector.extract_strided_slice %52 {offsets = [2, 0], sizes = [4, 256], strides = [1, 1]} : vector<6x256xf32> to vector<4x256xf32>
    %56 = tpu.concatenate %53, %54, %55 in 1 : vector<4x256xf32>, vector<4x256xf32>, vector<4x256xf32> -> vector<4x768xf32>
    %57 = vector.extract_strided_slice %36 {offsets = [8, 0], sizes = [8, 256], strides = [1, 1]} : vector<16x256xf32> to vector<8x256xf32>
    %58 = vector.extract_strided_slice %57 {offsets = [0, 0], sizes = [1, 256], strides = [1, 1]} : vector<8x256xf32> to vector<1x256xf32>
    %59 = vector.extract_strided_slice %57 {offsets = [1, 0], sizes = [1, 256], strides = [1, 1]} : vector<8x256xf32> to vector<1x256xf32>
    %60 = arith.maximumf %58, %59 : vector<1x256xf32>
    %61 = vector.extract_strided_slice %57 {offsets = [2, 0], sizes = [1, 256], strides = [1, 1]} : vector<8x256xf32> to vector<1x256xf32>
    %62 = vector.extract_strided_slice %57 {offsets = [3, 0], sizes = [1, 256], strides = [1, 1]} : vector<8x256xf32> to vector<1x256xf32>
    %63 = arith.maximumf %61, %62 : vector<1x256xf32>
    %64 = vector.extract_strided_slice %57 {offsets = [4, 0], sizes = [1, 256], strides = [1, 1]} : vector<8x256xf32> to vector<1x256xf32>
    %65 = vector.extract_strided_slice %57 {offsets = [5, 0], sizes = [1, 256], strides = [1, 1]} : vector<8x256xf32> to vector<1x256xf32>
    %66 = arith.maximumf %64, %65 : vector<1x256xf32>
    %67 = vector.extract_strided_slice %57 {offsets = [6, 0], sizes = [1, 256], strides = [1, 1]} : vector<8x256xf32> to vector<1x256xf32>
    %68 = vector.extract_strided_slice %57 {offsets = [7, 0], sizes = [1, 256], strides = [1, 1]} : vector<8x256xf32> to vector<1x256xf32>
    %69 = arith.maximumf %67, %68 : vector<1x256xf32>
    %70 = tpu.concatenate %60, %63, %66, %69 in 0 : vector<1x256xf32>, vector<1x256xf32>, vector<1x256xf32>, vector<1x256xf32> -> vector<4x256xf32>
    %71 = tpu.concatenate %37, %70, %37 in 0 : vector<1x256xf32>, vector<4x256xf32>, vector<1x256xf32> -> vector<6x256xf32>
    %72 = vector.extract_strided_slice %71 {offsets = [0, 0], sizes = [4, 256], strides = [1, 1]} : vector<6x256xf32> to vector<4x256xf32>
    %73 = vector.extract_strided_slice %71 {offsets = [1, 0], sizes = [4, 256], strides = [1, 1]} : vector<6x256xf32> to vector<4x256xf32>
    %74 = vector.extract_strided_slice %71 {offsets = [2, 0], sizes = [4, 256], strides = [1, 1]} : vector<6x256xf32> to vector<4x256xf32>
    %75 = tpu.concatenate %72, %73, %74 in 1 : vector<4x256xf32>, vector<4x256xf32>, vector<4x256xf32> -> vector<4x768xf32>
    %76 = tpu.concatenate %56, %75 in 0 : vector<4x768xf32>, vector<4x768xf32> -> vector<8x768xf32>
    %c0_i32_20 = arith.constant 0 : i32
    %77 = tpu.memref_slice %arg9[%c0_i32_20] : memref<3x!tpu.dma_semaphore, #tpu.memory_space<semaphore_mem>> -> memref<1x!tpu.dma_semaphore, #tpu.memory_space<semaphore_mem>>
    %78 = tpu.memref_squeeze %77 : memref<1x!tpu.dma_semaphore, #tpu.memory_space<semaphore_mem>> -> memref<!tpu.dma_semaphore, #tpu.memory_space<semaphore_mem>>
    tpu.wait_dma2 semaphore(%78 : memref<!tpu.dma_semaphore, #tpu.memory_space<semaphore_mem>>) src(%arg2 : memref<768x64xbf16, #tpu.memory_space<any>>) dst(%arg6 : memref<768x64xbf16, #tpu.memory_space<vmem>>)
    %c0_21 = arith.constant 0 : index
    %c0_22 = arith.constant 0 : index
    %79 = vector.load %arg6[%c0_21, %c0_22] : memref<768x64xbf16, #tpu.memory_space<vmem>>, vector<768x64xbf16>
    %80 = arith.truncf %76 : vector<8x768xf32> to vector<8x768xbf16>
    %cst_23 = arith.constant dense<0.000000e+00> : vector<8x64xf32>
    %81 = tpu.matmul %80, %79, %cst_23 {dimension_numbers = #tpu.dot_dimension_numbers<[1], [0], [0], [1], [0, 0, 1, 1], [], []>} : vector<8x768xbf16>, vector<768x64xbf16>, vector<8x64xf32> -> vector<8x64xf32>
    %c25 = arith.constant 25 : index
    %c0_24 = arith.constant 0 : index
    %82 = vector.load %arg1[%c25, %c0_24] : memref<32x256xf32, #tpu.memory_space<vmem>>, vector<1x64xf32>
    %83 = vector.broadcast %82 : vector<1x64xf32> to vector<8x64xf32>
    %84 = arith.addf %81, %83 : vector<8x64xf32>
    %cst_25 = arith.constant 0.000000e+00 : f32
    %85 = vector.broadcast %cst_25 : f32 to vector<8x64xf32>
    %86 = arith.maximumf %84, %85 : vector<8x64xf32>
    %87 = vector.extract_strided_slice %86 {offsets = [0, 0], sizes = [1, 64], strides = [1, 1]} : vector<8x64xf32> to vector<1x64xf32>
    %88 = vector.extract_strided_slice %86 {offsets = [2, 0], sizes = [1, 64], strides = [1, 1]} : vector<8x64xf32> to vector<1x64xf32>
    %89 = tpu.concatenate %87, %88 in 1 : vector<1x64xf32>, vector<1x64xf32> -> vector<1x128xf32>
    %90 = vector.extract_strided_slice %86 {offsets = [4, 0], sizes = [1, 64], strides = [1, 1]} : vector<8x64xf32> to vector<1x64xf32>
    %91 = vector.extract_strided_slice %86 {offsets = [6, 0], sizes = [1, 64], strides = [1, 1]} : vector<8x64xf32> to vector<1x64xf32>
    %92 = tpu.concatenate %90, %91 in 1 : vector<1x64xf32>, vector<1x64xf32> -> vector<1x128xf32>
    %93 = tpu.concatenate %89, %92 in 0 : vector<1x128xf32>, vector<1x128xf32> -> vector<2x128xf32>
    %c1_i32_26 = arith.constant 1 : i32
    %94 = tpu.memref_slice %arg9[%c1_i32_26] : memref<3x!tpu.dma_semaphore, #tpu.memory_space<semaphore_mem>> -> memref<1x!tpu.dma_semaphore, #tpu.memory_space<semaphore_mem>>
    %95 = tpu.memref_squeeze %94 : memref<1x!tpu.dma_semaphore, #tpu.memory_space<semaphore_mem>> -> memref<!tpu.dma_semaphore, #tpu.memory_space<semaphore_mem>>
    tpu.wait_dma2 semaphore(%95 : memref<!tpu.dma_semaphore, #tpu.memory_space<semaphore_mem>>) src(%arg3 : memref<128x256xbf16, #tpu.memory_space<any>>) dst(%arg7 : memref<128x256xbf16, #tpu.memory_space<vmem>>)
    %c0_27 = arith.constant 0 : index
    %c0_28 = arith.constant 0 : index
    %96 = vector.load %arg7[%c0_27, %c0_28] : memref<128x256xbf16, #tpu.memory_space<vmem>>, vector<128x256xbf16>
    %97 = arith.truncf %93 : vector<2x128xf32> to vector<2x128xbf16>
    %cst_29 = arith.constant dense<0.000000e+00> : vector<2x256xf32>
    %98 = tpu.matmul %97, %96, %cst_29 {dimension_numbers = #tpu.dot_dimension_numbers<[1], [0], [0], [1], [0, 0, 1, 1], [], []>} : vector<2x128xbf16>, vector<128x256xbf16>, vector<2x256xf32> -> vector<2x256xf32>
    %c26 = arith.constant 26 : index
    %c0_30 = arith.constant 0 : index
    %99 = vector.load %arg1[%c26, %c0_30] : memref<32x256xf32, #tpu.memory_space<vmem>>, vector<1x256xf32>
    %100 = vector.broadcast %99 : vector<1x256xf32> to vector<2x256xf32>
    %101 = arith.addf %98, %100 : vector<2x256xf32>
    %cst_31 = arith.constant 0.000000e+00 : f32
    %102 = vector.broadcast %cst_31 : f32 to vector<2x256xf32>
    %103 = arith.maximumf %101, %102 : vector<2x256xf32>
    %c2_i32_32 = arith.constant 2 : i32
    %104 = tpu.memref_slice %arg9[%c2_i32_32] : memref<3x!tpu.dma_semaphore, #tpu.memory_space<semaphore_mem>> -> memref<1x!tpu.dma_semaphore, #tpu.memory_space<semaphore_mem>>
    %105 = tpu.memref_squeeze %104 : memref<1x!tpu.dma_semaphore, #tpu.memory_space<semaphore_mem>> -> memref<!tpu.dma_semaphore, #tpu.memory_space<semaphore_mem>>
    tpu.wait_dma2 semaphore(%105 : memref<!tpu.dma_semaphore, #tpu.memory_space<semaphore_mem>>) src(%arg4 : memref<384x128xbf16, #tpu.memory_space<any>>) dst(%arg8 : memref<384x128xbf16, #tpu.memory_space<vmem>>)
    %c0_33 = arith.constant 0 : index
    %c0_34 = arith.constant 0 : index
    %106 = vector.load %arg8[%c0_33, %c0_34] : memref<384x128xbf16, #tpu.memory_space<vmem>>, vector<256x128xbf16>
    %107 = arith.truncf %103 : vector<2x256xf32> to vector<2x256xbf16>
    %cst_35 = arith.constant dense<0.000000e+00> : vector<2x128xf32>
    %108 = tpu.matmul %107, %106, %cst_35 {dimension_numbers = #tpu.dot_dimension_numbers<[1], [0], [0], [1], [0, 0, 1, 1], [], []>} : vector<2x256xbf16>, vector<256x128xbf16>, vector<2x128xf32> -> vector<2x128xf32>
    %c27 = arith.constant 27 : index
    %c0_36 = arith.constant 0 : index
    %109 = vector.load %arg1[%c27, %c0_36] : memref<32x256xf32, #tpu.memory_space<vmem>>, vector<1x128xf32>
    %110 = vector.broadcast %109 : vector<1x128xf32> to vector<2x128xf32>
    %111 = arith.addf %108, %110 : vector<2x128xf32>
    %cst_37 = arith.constant 0.000000e+00 : f32
    %112 = vector.broadcast %cst_37 : f32 to vector<2x128xf32>
    %113 = arith.maximumf %111, %112 : vector<2x128xf32>
    %c256 = arith.constant 256 : index
    %c0_38 = arith.constant 0 : index
    %114 = vector.load %arg8[%c256, %c0_38] : memref<384x128xbf16, #tpu.memory_space<vmem>>, vector<128x128xbf16>
    %115 = arith.truncf %113 : vector<2x128xf32> to vector<2x128xbf16>
    %cst_39 = arith.constant dense<0.000000e+00> : vector<2x128xf32>
    %116 = tpu.matmul %115, %114, %cst_39 {dimension_numbers = #tpu.dot_dimension_numbers<[1], [0], [0], [1], [0, 0, 1, 1], [], []>} : vector<2x128xbf16>, vector<128x128xbf16>, vector<2x128xf32> -> vector<2x128xf32>
    %c28 = arith.constant 28 : index
    %c0_40 = arith.constant 0 : index
    %117 = vector.load %arg1[%c28, %c0_40] : memref<32x256xf32, #tpu.memory_space<vmem>>, vector<1x128xf32>
    %118 = vector.broadcast %117 : vector<1x128xf32> to vector<2x128xf32>
    %119 = arith.addf %116, %118 : vector<2x128xf32>
    %cst_41 = arith.constant 0.000000e+00 : f32
    %120 = vector.broadcast %cst_41 : f32 to vector<2x128xf32>
    %121 = arith.maximumf %119, %120 : vector<2x128xf32>
    %c29 = arith.constant 29 : index
    %c0_42 = arith.constant 0 : index
    %122 = vector.load %arg1[%c29, %c0_42] : memref<32x256xf32, #tpu.memory_space<vmem>>, vector<1x128xf32>
    %123 = vector.broadcast %122 : vector<1x128xf32> to vector<2x128xf32>
    %124 = arith.mulf %121, %123 : vector<2x128xf32>
    %cst_43 = arith.constant dense<0.000000e+00> : vector<2xf32>
    %125 = vector.multi_reduction <add>, %124, %cst_43 [1] : vector<2x128xf32> to vector<2xf32>
    %126 = vector.shape_cast %125 : vector<2xf32> to vector<2x1xf32>
    %c30 = arith.constant 30 : index
    %c0_44 = arith.constant 0 : index
    %127 = vector.load %arg1[%c30, %c0_44] : memref<32x256xf32, #tpu.memory_space<vmem>>, vector<1x1xf32>
    %128 = vector.broadcast %127 : vector<1x1xf32> to vector<2x1xf32>
    %129 = arith.addf %126, %128 : vector<2x1xf32>
    %c0_45 = arith.constant 0 : index
    %c0_46 = arith.constant 0 : index
    %130 = vector.load %arg5[%c0_45, %c0_46] : memref<2x1xf32, #tpu.memory_space<vmem>>, vector<2x1xf32>
    tpu.vector_store %arg5[%c0_45, %c0_46], %129 {strides = array<i32>} : memref<2x1xf32, #tpu.memory_space<vmem>>, vector<2x1xf32>,
    return
  }
}

</mosaic_0001>

<bundles_post_ra>
// kernel: mycnn_forward.1
= control target key start
LH: loop header
LB: loop body
LE: loop exit
PB: predicated region body
PF: predicated region fallthrough
CT: control target
= control target key end

     0   :  { %s2404_s0 = inlined_call_operand.vmem [shape: f32[2,2,8,4], index: 0, kind: input, shape index: {}]   ;;  %s2405_s1 = inlined_call_operand.vmem [shape: f32[32,256], index: 1, kind: input, shape index: {}]   ;;  %s2406_s2 = inlined_call_operand.vmem [shape: bf16[768,64], index: 2, kind: input, shape index: {}]   ;;  %s2407_s3 = inlined_call_operand.vmem [shape: bf16[128,256], index: 3, kind: input, shape index: {}]   ;;  %s2408_s4 = inlined_call_operand.vmem [shape: bf16[384,128], index: 4, kind: input, shape index: {}]   ;;  %s2409_s5 = inlined_call_operand.vmem [shape: f32[2,1], index: 5, kind: output, shape index: {}]  }
   0x1   :  { %v48_v0 = vld [vmem:[%s2406_s2] sm:$0xff]  ;;  %v50_v1 = vld [vmem:[%s2406_s2 + $0x8] sm:$0xff]  ;;  %v52_v2 = vld [vmem:[%s2406_s2 + $0x10] sm:$0xff] }
   0x2   :  { %49 = vst [vmem:[#allocation2] sm:$0xff] %v48_v0  ;;  %51 = vst [vmem:[#allocation2 + $0x8] sm:$0xff] %v50_v1  ;;  %v54_v3 = vld [vmem:[%s2406_s2 + $0x18] sm:$0xff]  ;;  %v56_v4 = vld [vmem:[%s2406_s2 + $0x20] sm:$0xff] }
   0x3   :  { %53 = vst [vmem:[#allocation2 + $0x10] sm:$0xff] %v52_v2  ;;  %v58_v5 = vld [vmem:[%s2406_s2 + $0x28] sm:$0xff]  ;;  %55 = vst [vmem:[#allocation2 + $0x18] sm:$0xff] %v54_v3  ;;  %v60_v6 = vld [vmem:[%s2406_s2 + $0x30] sm:$0xff] }
   0x4   :  { %57 = vst [vmem:[#allocation2 + $0x20] sm:$0xff] %v56_v4  ;;  %59 = vst [vmem:[#allocation2 + $0x28] sm:$0xff] %v58_v5  ;;  %v62_v7 = vld [vmem:[%s2406_s2 + $0x38] sm:$0xff]  ;;  %v64_v8 = vld [vmem:[%s2406_s2 + $0x40] sm:$0xff] }
   0x5   :  { %61 = vst [vmem:[#allocation2 + $0x30] sm:$0xff] %v60_v6  ;;  %63 = vst [vmem:[#allocation2 + $0x38] sm:$0xff] %v62_v7  ;;  %v66_v9 = vld [vmem:[%s2406_s2 + $0x48] sm:$0xff]  ;;  %v68_v10 = vld [vmem:[%s2406_s2 + $0x50] sm:$0xff] }
   0x6   :  { %65 = vst [vmem:[#allocation2 + $0x40] sm:$0xff] %v64_v8  ;;  %v70_v11 = vld [vmem:[%s2406_s2 + $0x58] sm:$0xff]  ;;  %67 = vst [vmem:[#allocation2 + $0x48] sm:$0xff] %v66_v9  ;;  %v72_v12 = vld [vmem:[%s2406_s2 + $0x60] sm:$0xff] }
   0x7   :  { %69 = vst [vmem:[#allocation2 + $0x50] sm:$0xff] %v68_v10  ;;  %71 = vst [vmem:[#allocation2 + $0x58] sm:$0xff] %v70_v11  ;;  %v74_v13 = vld [vmem:[%s2406_s2 + $0x68] sm:$0xff]  ;;  %v76_v14 = vld [vmem:[%s2406_s2 + $0x70] sm:$0xff] }
   0x8   :  { %73 = vst [vmem:[#allocation2 + $0x60] sm:$0xff] %v72_v12  ;;  %75 = vst [vmem:[#allocation2 + $0x68] sm:$0xff] %v74_v13  ;;  %v78_v15 = vld [vmem:[%s2406_s2 + $0x78] sm:$0xff]  ;;  %v80_v16 = vld [vmem:[%s2406_s2 + $0x80] sm:$0xff] }
   0x9   :  { %77 = vst [vmem:[#allocation2 + $0x70] sm:$0xff] %v76_v14  ;;  %v82_v17 = vld [vmem:[%s2406_s2 + $0x88] sm:$0xff]  ;;  %79 = vst [vmem:[#allocation2 + $0x78] sm:$0xff] %v78_v15  ;;  %v84_v18 = vld [vmem:[%s2406_s2 + $0x90] sm:$0xff] }
   0xa   :  { %81 = vst [vmem:[#allocation2 + $0x80] sm:$0xff] %v80_v16  ;;  %83 = vst [vmem:[#allocation2 + $0x88] sm:$0xff] %v82_v17  ;;  %v86_v19 = vld [vmem:[%s2406_s2 + $0x98] sm:$0xff]  ;;  %v88_v20 = vld [vmem:[%s2406_s2 + $0xa0] sm:$0xff] }
   0xb   :  { %85 = vst [vmem:[#allocation2 + $0x90] sm:$0xff] %v84_v18  ;;  %87 = vst [vmem:[#allocation2 + $0x98] sm:$0xff] %v86_v19  ;;  %v90_v21 = vld [vmem:[%s2406_s2 + $0xa8] sm:$0xff]  ;;  %v92_v22 = vld [vmem:[%s2406_s2 + $0xb0] sm:$0xff] }
   0xc   :  { %89 = vst [vmem:[#allocation2 + $0xa0] sm:$0xff] %v88_v20  ;;  %v94_v23 = vld [vmem:[%s2406_s2 + $0xb8] sm:$0xff]  ;;  %91 = vst [vmem:[#allocation2 + $0xa8] sm:$0xff] %v90_v21  ;;  %v96_v24 = vld [vmem:[%s2406_s2 + $0xc0] sm:$0xff] }
   0xd   :  { %93 = vst [vmem:[#allocation2 + $0xb0] sm:$0xff] %v92_v22  ;;  %95 = vst [vmem:[#allocation2 + $0xb8] sm:$0xff] %v94_v23  ;;  %v98_v25 = vld [vmem:[%s2406_s2 + $0xc8] sm:$0xff]  ;;  %v100_v26 = vld [vmem:[%s2406_s2 + $0xd0] sm:$0xff] }
   0xe   :  { %97 = vst [vmem:[#allocation2 + $0xc0] sm:$0xff] %v96_v24  ;;  %99 = vst [vmem:[#allocation2 + $0xc8] sm:$0xff] %v98_v25  ;;  %v102_v27 = vld [vmem:[%s2406_s2 + $0xd8] sm:$0xff]  ;;  %v104_v28 = vld [vmem:[%s2406_s2 + $0xe0] sm:$0xff] }
   0xf   :  { %101 = vst [vmem:[#allocation2 + $0xd0] sm:$0xff] %v100_v26  ;;  %v106_v29 = vld [vmem:[%s2406_s2 + $0xe8] sm:$0xff]  ;;  %103 = vst [vmem:[#allocation2 + $0xd8] sm:$0xff] %v102_v27  ;;  %v108_v30 = vld [vmem:[%s2406_s2 + $0xf0] sm:$0xff] }
  0x10   :  { %105 = vst [vmem:[#allocation2 + $0xe0] sm:$0xff] %v104_v28  ;;  %107 = vst [vmem:[#allocation2 + $0xe8] sm:$0xff] %v106_v29  ;;  %v110_v31 = vld [vmem:[%s2406_s2 + $0xf8] sm:$0xff]  ;;  %v112_v32 = vld [vmem:[%s2406_s2 + $0x100] sm:$0xff] }
  0x11   :  { %109 = vst [vmem:[#allocation2 + $0xf0] sm:$0xff] %v108_v30  ;;  %111 = vst [vmem:[#allocation2 + $0xf8] sm:$0xff] %v110_v31  ;;  %v114_v33 = vld [vmem:[%s2406_s2 + $0x108] sm:$0xff]  ;;  %v116_v34 = vld [vmem:[%s2406_s2 + $0x110] sm:$0xff] }
  0x12   :  { %113 = vst [vmem:[#allocation2 + $0x100] sm:$0xff] %v112_v32  ;;  %v118_v35 = vld [vmem:[%s2406_s2 + $0x118] sm:$0xff]  ;;  %115 = vst [vmem:[#allocation2 + $0x108] sm:$0xff] %v114_v33  ;;  %v120_v36 = vld [vmem:[%s2406_s2 + $0x120] sm:$0xff] }
  0x13   :  { %117 = vst [vmem:[#allocation2 + $0x110] sm:$0xff] %v116_v34  ;;  %119 = vst [vmem:[#allocation2 + $0x118] sm:$0xff] %v118_v35  ;;  %v122_v37 = vld [vmem:[%s2406_s2 + $0x128] sm:$0xff]  ;;  %v124_v38 = vld [vmem:[%s2406_s2 + $0x130] sm:$0xff] }
  0x14   :  { %121 = vst [vmem:[#allocation2 + $0x120] sm:$0xff] %v120_v36  ;;  %123 = vst [vmem:[#allocation2 + $0x128] sm:$0xff] %v122_v37  ;;  %v126_v39 = vld [vmem:[%s2406_s2 + $0x138] sm:$0xff]  ;;  %v128_v40 = vld [vmem:[%s2406_s2 + $0x140] sm:$0xff] }
  0x15   :  { %125 = vst [vmem:[#allocation2 + $0x130] sm:$0xff] %v124_v38  ;;  %v130_v41 = vld [vmem:[%s2406_s2 + $0x148] sm:$0xff]  ;;  %127 = vst [vmem:[#allocation2 + $0x138] sm:$0xff] %v126_v39  ;;  %v132_v42 = vld [vmem:[%s2406_s2 + $0x150] sm:$0xff] }
  0x16   :  { %129 = vst [vmem:[#allocation2 + $0x140] sm:$0xff] %v128_v40  ;;  %131 = vst [vmem:[#allocation2 + $0x148] sm:$0xff] %v130_v41  ;;  %v134_v43 = vld [vmem:[%s2406_s2 + $0x158] sm:$0xff]  ;;  %v136_v44 = vld [vmem:[%s2406_s2 + $0x160] sm:$0xff] }
  0x17   :  { %133 = vst [vmem:[#allocation2 + $0x150] sm:$0xff] %v132_v42  ;;  %135 = vst [vmem:[#allocation2 + $0x158] sm:$0xff] %v134_v43  ;;  %v138_v45 = vld [vmem:[%s2406_s2 + $0x168] sm:$0xff]  ;;  %v140_v46 = vld [vmem:[%s2406_s2 + $0x170] sm:$0xff] }
  0x18   :  { %137 = vst [vmem:[#allocation2 + $0x160] sm:$0xff] %v136_v44  ;;  %v142_v47 = vld [vmem:[%s2406_s2 + $0x178] sm:$0xff]  ;;  %139 = vst [vmem:[#allocation2 + $0x168] sm:$0xff] %v138_v45 }
  0x19   :  { %141 = vst [vmem:[#allocation2 + $0x170] sm:$0xff] %v140_v46  ;;  %143 = vst [vmem:[#allocation2 + $0x178] sm:$0xff] %v142_v47 }
  0x1a   :  { %151 = vsyncadd [#allocation5], 6144  ;;  %v2103_v48 = vld [vmem:[%s2407_s3] sm:$0xff]  ;;  %v2108_v49 = vld [vmem:[%s2407_s3 + $0x8] sm:$0xff] }
  0x1b   :  { %v2113_v50 = vld [vmem:[%s2407_s3 + $0x10] sm:$0xff]  ;;  %v2118_v51 = vld [vmem:[%s2407_s3 + $0x18] sm:$0xff]  ;;  %v2123_v52 = vld [vmem:[%s2407_s3 + $0x20] sm:$0xff] }
  0x1c   :  { %v2128_v53 = vld [vmem:[%s2407_s3 + $0x28] sm:$0xff]  ;;  %v2133_v54 = vld [vmem:[%s2407_s3 + $0x30] sm:$0xff]  ;;  %v2138_v55 = vld [vmem:[%s2407_s3 + $0x38] sm:$0xff] }
  0x1d   :  { %v2143_v56 = vld [vmem:[%s2407_s3 + $0x40] sm:$0xff]  ;;  %v2148_v57 = vld [vmem:[%s2407_s3 + $0x48] sm:$0xff]  ;;  %v2153_v58 = vld [vmem:[%s2407_s3 + $0x50] sm:$0xff] }
  0x1e   :  { %v2158_v59 = vld [vmem:[%s2407_s3 + $0x58] sm:$0xff]  ;;  %v2163_v60 = vld [vmem:[%s2407_s3 + $0x60] sm:$0xff]  ;;  %v2168_v61 = vld [vmem:[%s2407_s3 + $0x68] sm:$0xff] }
  0x1f   :  { %v2173_v62 = vld [vmem:[%s2407_s3 + $0x70] sm:$0xff]  ;;  %v2178_v63 = vld [vmem:[%s2407_s3 + $0x78] sm:$0xff] }
  0x20   :  { %225 = vsyncadd [#allocation5 + $0x1], 2048  ;;  %v260_v0 = vld [vmem:[%s2408_s4] sm:$0xff]  ;;  %v262_v1 = vld [vmem:[%s2408_s4 + $0x8] sm:$0xff] }
  0x21   :  { %261 = vst [vmem:[#allocation4] sm:$0xff] %v260_v0  ;;  %263 = vst [vmem:[#allocation4 + $0x8] sm:$0xff] %v262_v1  ;;  %v264_v2 = vld [vmem:[%s2408_s4 + $0x10] sm:$0xff]  ;;  %v266_v3 = vld [vmem:[%s2408_s4 + $0x18] sm:$0xff] }
  0x22   :  { %v268_v4 = vld [vmem:[%s2408_s4 + $0x20] sm:$0xff]  ;;  %265 = vst [vmem:[#allocation4 + $0x10] sm:$0xff] %v264_v2  ;;  %267 = vst [vmem:[#allocation4 + $0x18] sm:$0xff] %v266_v3  ;;  %v270_v5 = vld [vmem:[%s2408_s4 + $0x28] sm:$0xff] }
  0x23   :  { %269 = vst [vmem:[#allocation4 + $0x20] sm:$0xff] %v268_v4  ;;  %v272_v6 = vld [vmem:[%s2408_s4 + $0x30] sm:$0xff]  ;;  %v274_v7 = vld [vmem:[%s2408_s4 + $0x38] sm:$0xff]  ;;  %271 = vst [vmem:[#allocation4 + $0x28] sm:$0xff] %v270_v5 }
  0x24   :  { %273 = vst [vmem:[#allocation4 + $0x30] sm:$0xff] %v272_v6  ;;  %275 = vst [vmem:[#allocation4 + $0x38] sm:$0xff] %v274_v7  ;;  %v276_v8 = vld [vmem:[%s2408_s4 + $0x40] sm:$0xff]  ;;  %v278_v9 = vld [vmem:[%s2408_s4 + $0x48] sm:$0xff] }
  0x25   :  { %v280_v10 = vld [vmem:[%s2408_s4 + $0x50] sm:$0xff]  ;;  %277 = vst [vmem:[#allocation4 + $0x40] sm:$0xff] %v276_v8  ;;  %279 = vst [vmem:[#allocation4 + $0x48] sm:$0xff] %v278_v9  ;;  %v282_v11 = vld [vmem:[%s2408_s4 + $0x58] sm:$0xff] }
  0x26   :  { %281 = vst [vmem:[#allocation4 + $0x50] sm:$0xff] %v280_v10  ;;  %v284_v12 = vld [vmem:[%s2408_s4 + $0x60] sm:$0xff]  ;;  %v286_v13 = vld [vmem:[%s2408_s4 + $0x68] sm:$0xff]  ;;  %283 = vst [vmem:[#allocation4 + $0x58] sm:$0xff] %v282_v11 }
  0x27   :  { %285 = vst [vmem:[#allocation4 + $0x60] sm:$0xff] %v284_v12  ;;  %287 = vst [vmem:[#allocation4 + $0x68] sm:$0xff] %v286_v13  ;;  %v288_v14 = vld [vmem:[%s2408_s4 + $0x70] sm:$0xff]  ;;  %v290_v15 = vld [vmem:[%s2408_s4 + $0x78] sm:$0xff] }
  0x28   :  { %v292_v16 = vld [vmem:[%s2408_s4 + $0x80] sm:$0xff]  ;;  %289 = vst [vmem:[#allocation4 + $0x70] sm:$0xff] %v288_v14  ;;  %291 = vst [vmem:[#allocation4 + $0x78] sm:$0xff] %v290_v15  ;;  %v294_v17 = vld [vmem:[%s2408_s4 + $0x88] sm:$0xff] }
  0x29   :  { %293 = vst [vmem:[#allocation4 + $0x80] sm:$0xff] %v292_v16  ;;  %v296_v18 = vld [vmem:[%s2408_s4 + $0x90] sm:$0xff]  ;;  %v298_v19 = vld [vmem:[%s2408_s4 + $0x98] sm:$0xff]  ;;  %295 = vst [vmem:[#allocation4 + $0x88] sm:$0xff] %v294_v17 }
  0x2a   :  { %297 = vst [vmem:[#allocation4 + $0x90] sm:$0xff] %v296_v18  ;;  %299 = vst [vmem:[#allocation4 + $0x98] sm:$0xff] %v298_v19  ;;  %v300_v20 = vld [vmem:[%s2408_s4 + $0xa0] sm:$0xff]  ;;  %v302_v21 = vld [vmem:[%s2408_s4 + $0xa8] sm:$0xff] }
  0x2b   :  { %v304_v22 = vld [vmem:[%s2408_s4 + $0xb0] sm:$0xff]  ;;  %301 = vst [vmem:[#allocation4 + $0xa0] sm:$0xff] %v300_v20  ;;  %303 = vst [vmem:[#allocation4 + $0xa8] sm:$0xff] %v302_v21  ;;  %v306_v23 = vld [vmem:[%s2408_s4 + $0xb8] sm:$0xff] }
  0x2c   :  { %305 = vst [vmem:[#allocation4 + $0xb0] sm:$0xff] %v304_v22  ;;  %307 = vst [vmem:[#allocation4 + $0xb8] sm:$0xff] %v306_v23  ;;  %v1600_v24 = vld [vmem:[%s2404_s0 + $0x8] sm:$0xff]  ;;  %v1602_v25 = vld [vmem:[%s2404_s0 + $0x18] sm:$0xff] }
  0x2d   :  { %v1826_v26 = vpack.i.bf16 %v1602_v25, %v1600_v24 }
  0x2e   :  { %315 = vsyncadd [#allocation5 + $0x2], 3072  ;;  %v386_v27 = vld [vmem:[%s2405_s1 + $0x28] sm:$0xff]  ;;  %vm409_vm0 = vcmask 1043456   ;;  %v385_v28 = vld [vmem:[%s2405_s1 + $0x20] sm:$0xff]  ;;  %s1919_s4 = smov 4  }
  0x2f   :  { %1827 = vrot.lane.b32.xlu0 %v1826_v26, %s1919_s4  ;;  %v390_v29 = vpack.c.bf16 %v386_v27, %v386_v27  ;;  %v389_v30 = vpack.c.bf16 %v385_v28, %v385_v28  ;;  %v1601_v32 = vld [vmem:[%s2404_s0 + $0x10] sm:$0xff]  ;;  %v382_v33 = vld [vmem:[%s2405_s1 + $0x8] sm:$0xff]  ;;  %v384_v34 = vld [vmem:[%s2405_s1 + $0x18] sm:$0xff]  ;;  %vm323_vm1 = vcmask 31744   ;;  %vm328_vm2 = vcmask 1040384   ;;  %s1922_s7 = smov 8  }
  0x30   :  { %v316_v36 = vld [vmem:[%s2404_s0] sm:$0xff]  ;;  %v388_v37 = vpack.c.bf16 %v384_v34, %v382_v33  ;;  %v383_v39 = vld [vmem:[%s2405_s1 + $0x10] sm:$0xff]  ;;  %v1920_v47 = vmov 0   ;;  %vm340_vm3 = vcmask 1045504   ;;  %vm333_vm4 = vcmask 1046528   ;;  %s1921_s0 = smov 16  }
  0x31   :  { %1604 = vmatprep.subr.msk.bf16.mxu0 %vm409_vm0, %v390_v29  ;;  %v411_v31 = vsel %vm409_vm0, %v389_v30, 0  ;;  %v381_v38 = vld [vmem:[%s2405_s1] sm:$0xff]  ;;  %448 = vmatprep.mubr.bf16.mxu0 %v1920_v47  ;;  %vm347_vm5 = vcmask 64512   ;;  %vm349_vm6 = vcmask 130048   ;;  %vm405_vm7 = vcmask 195584  }
  0x32   :  { %429 = vmatpush1.bf16.msra.mxu0 %v411_v31  ;;  %v387_v42 = vpack.c.bf16 %v383_v39, %v381_v38  ;;  %v395_v29 = vlaneseq  ;;  %vm487_vm8 = vcmask 1041408   ;;  %vm490_vm9 = vcmask 1042432  }
  0x33   :  { %430 = vmatprep.subr.bf16.mxu0 %v388_v37  ;;  %vm501_vm10 = vcmask 1044480  }
  0x34   :  { %v2291_v30 = vshrl.u32 %v395_v29, 7 }
  0x36   :  { %431 = vmatpush1.bf16.msra.mxu0 %v387_v42  ;;  %v397_v31 = vsub.s32 0, %v2291_v30  ;;  %v401_v33 = vsub.s32 1, %v2291_v30 }
  0xa1   :  { %v1828_v35 = vpop.permute.xlu0 %1827 }
  0xa2   :  { %v1830_v40 = vunpack.i.h.bf16 %v1828_v35  ;;  %v1829_v41 = vunpack.i.l.bf16 %v1828_v35 }
  0xa4   :  { %v359_v43 = vsel %vm323_vm1, %v1601_v32, %v1830_v40  ;;  %v324_v44 = vsel %vm323_vm1, %v316_v36, %v1829_v41  ;;  %v1603_v32 = vld [vmem:[%s2405_s1 + $0x30] ss:$8 sm:$0x3] }
  0xa5   :  { %v361_v45 = vrot.slane %v359_v43, 7  ;;  %v326_v46 = vrot.slane %v324_v44, 7  ;;  %v398_v34 = vrot.slane %v1603_v32, %v397_v31  ;;  %v402_v35 = vrot.slane %v1603_v32, %v401_v33 }
  0xa7   :  { %v363_v0 = vsel %vm328_vm2, 0.0, %v361_v45  ;;  %v329_v1 = vsel %vm328_vm2, 0.0, %v326_v46  ;;  %v330_v2 = vsel %vm328_vm2, %v326_v46, 0.0  ;;  %v364_v3 = vsel %vm328_vm2, %v361_v45, 0.0 }
  0xa8   :  { %v335_v4 = vrot.slane %v330_v2, 1  ;;  %v341_v5 = vrot.slane %v329_v1, 2  ;;  %v342_v6 = vrot.slane %v330_v2, 2  ;;  %v368_v7 = vrot.slane %v364_v3, 1 }
  0xa9   :  { %v373_v8 = vrot.slane %v363_v0, 2  ;;  %v374_v9 = vrot.slane %v364_v3, 2  ;;  %v334_v10 = vrot.slane %v329_v1, 1  ;;  %v367_v11 = vrot.slane %v363_v0, 1 }
  0xaa   :  { %v343_v12 = vsel %vm340_vm3, %v341_v5, %v342_v6 }
  0xab   :  { %v375_v13 = vsel %vm340_vm3, %v373_v8, %v374_v9  ;;  %v336_v14 = vsel %vm333_vm4, %v334_v10, %v335_v4  ;;  %v369_v15 = vsel %vm333_vm4, %v367_v11, %v368_v7 }
  0xac   :  { %v1836_v16 = vpack.i.bf16 %v375_v13, %v343_v12  ;;  %v1831_v17 = vpack.i.bf16 %v369_v15, %v336_v14 }
  0xae   :  { %1837 = vrot.lane.b32.xlu1 %v1836_v16, %s1921_s0  ;;  %1832 = vrot.lane.b32.xlu0 %v1831_v17, %s1922_s7 }
 0x120   :  { %v1838_v18 = vpop.permute.xlu1 %1837  ;;  %v1833_v19 = vpop.permute.xlu0 %1832 }
 0x121   :  { %v1840_v20 = vunpack.i.h.bf16 %v1838_v18  ;;  %v1839_v21 = vunpack.i.l.bf16 %v1838_v18  ;;  %v1835_v22 = vunpack.i.h.bf16 %v1833_v19  ;;  %v1834_v23 = vunpack.i.l.bf16 %v1833_v19 }
 0x123   :  { %v379_v24 = vsel %vm347_vm5, %v363_v0, %v1835_v22  ;;  %v348_v25 = vsel %vm347_vm5, %v329_v1, %v1834_v23 }
 0x124   :  { %v380_v26 = vsel %vm349_vm6, %v379_v24, %v1840_v20  ;;  %v350_v27 = vsel %vm349_vm6, %v348_v25, %v1839_v21 }
 0x125   :  { %v391_v28 = vpack.c.bf16 %v380_v26, %v350_v27 }
 0x127   :  { %1605 = vmatmul.mubr.msk.bf16.vlgmr.msra.gmra.mxu0 %vm405_vm7, %v391_v28 }
 0x1e7   :  { %v450_v36 = vpop.f32.mrf.mxu0 }
 0x1e8   :  { %v451_v37 = vadd.f32 %v450_v36, %v398_v34 }
 0x1e9   :  { %v452_v38 = vpop.f32.mrf.mxu0 }
 0x1ea   :  { %v459_v39 = vmax.f32 %v451_v37, 0.0  ;;  %v453_v40 = vadd.f32 %v452_v38, %v402_v35 }
 0x1eb   :  { %v454_v41 = vpop.f32.mrf.mxu0 }
 0x1ec   :  { %v465_v42 = vrot.slane %v459_v39, 1  ;;  %v460_v43 = vmax.f32 %v453_v40, 0.0  ;;  %v455_v44 = vadd.f32 %v454_v41, %v398_v34 }
 0x1ed   :  { %v456_v45 = vpop.f32.mrf.mxu0 }
 0x1ee   :  { %v469_v46 = vmax.f32 %v459_v39, %v465_v42  ;;  %v466_v0 = vrot.slane %v460_v43, 1  ;;  %v461_v1 = vmax.f32 %v455_v44, 0.0  ;;  %v457_v2 = vadd.f32 %v456_v45, %v402_v35 }
 0x1f0   :  { %v473_v3 = vrot.slane %v469_v46, 1  ;;  %v477_v4 = vrot.slane %v469_v46, 2  ;;  %v470_v5 = vmax.f32 %v460_v43, %v466_v0  ;;  %v516_v6 = vrot.slane %v461_v1, 1 }
 0x1f1   :  { %v462_v7 = vmax.f32 %v457_v2, 0.0  ;;  %v481_v8 = vrot.slane %v469_v46, 3 }
 0x1f2   :  { %v485_v9 = vsel %vm328_vm2, %v469_v46, %v473_v3  ;;  %v474_v10 = vrot.slane %v470_v5, 1  ;;  %v478_v11 = vrot.slane %v470_v5, 2  ;;  %v520_v13 = vmax.f32 %v461_v1, %v516_v6 }
 0x1f3   :  { %v488_v12 = vsel %vm487_vm8, %v485_v9, %v477_v4  ;;  %v517_v14 = vrot.slane %v462_v7, 1  ;;  %v482_v16 = vrot.slane %v470_v5, 3 }
 0x1f4   :  { %v491_v15 = vsel %vm490_vm9, %v488_v12, %v481_v8  ;;  %v486_v17 = vsel %vm328_vm2, %v470_v5, %v474_v10  ;;  %v524_v20 = vrot.slane %v520_v13, 1  ;;  %v528_v21 = vrot.slane %v520_v13, 2 }
 0x1f5   :  { %v495_v18 = vrot.slane %v491_v15, 7  ;;  %v489_v19 = vsel %vm487_vm8, %v486_v17, %v478_v11  ;;  %v521_v23 = vmax.f32 %v462_v7, %v517_v14  ;;  %v532_v26 = vrot.slane %v520_v13, 3 }
 0x1f6   :  { %v492_v22 = vsel %vm490_vm9, %v489_v19, %v482_v16  ;;  %v536_v27 = vsel %vm328_vm2, %v520_v13, %v524_v20 }
 0x1f7   :  { %v499_v24 = vsel %vm328_vm2, 0.0, %v495_v18  ;;  %v496_v25 = vrot.slane %v492_v22, 7  ;;  %v538_v28 = vsel %vm487_vm8, %v536_v27, %v528_v21  ;;  %v525_v29 = vrot.slane %v521_v23, 1 }
 0x1f8   :  { %v529_v32 = vrot.slane %v521_v23, 2  ;;  %v540_v35 = vsel %vm490_vm9, %v538_v28, %v532_v26  ;;  %v502_v36 = vsel %vm501_vm10, %v499_v24, 0.0  ;;  %v533_v38 = vrot.slane %v521_v23, 3 }
 0x1f9   :  { %v500_v34 = vsel %vm328_vm2, 0.0, %v496_v25  ;;  %v544_v37 = vrot.slane %v540_v35, 7  ;;  %v537_v39 = vsel %vm328_vm2, %v521_v23, %v525_v29  ;;  %v506_v44 = vrot.slane %v502_v36, 1 }
 0x1fa   :  { %v539_v40 = vsel %vm487_vm8, %v537_v39, %v529_v32  ;;  %v503_v41 = vsel %vm501_vm10, %v500_v34, 0.0  ;;  %v510_v0 = vrot.slane %v502_v36, 2 }
 0x1fb   :  { %v548_v42 = vsel %vm328_vm2, 0.0, %v544_v37  ;;  %v541_v43 = vsel %vm490_vm9, %v539_v40, %v533_v38  ;;  %v507_v4 = vrot.slane %v503_v41, 1  ;;  %v511_v10 = vrot.slane %v503_v41, 2 }
 0x1fc   :  { %v550_v45 = vsel %vm501_vm10, %v548_v42, 0.0  ;;  %v545_v46 = vrot.slane %v541_v43, 7 }
 0x1fd   :  { %v558_v1 = vrot.slane %v550_v45, 4  ;;  %v1606_v2 = vrot.slane %v550_v45, 5  ;;  %v1608_v3 = vrot.slane %v550_v45, 6 }
 0x1fe   :  { %v549_v5 = vsel %vm328_vm2, 0.0, %v545_v46 }
 0x1ff   :  { %v2322_v6 = vsel %vm409_vm0, %v502_v36, %v558_v1  ;;  %v2325_v7 = vsel %vm409_vm0, %v506_v44, %v1606_v2  ;;  %v2328_v8 = vsel %vm409_vm0, %v510_v0, %v1608_v3  ;;  %v551_v9 = vsel %vm501_vm10, %v549_v5, 0.0 }
 0x200   :  { %v559_v11 = vrot.slane %v551_v9, 4  ;;  %v1607_v12 = vrot.slane %v551_v9, 5  ;;  %v1609_v13 = vrot.slane %v551_v9, 6 }
 0x202   :  { %v571_v14 = vsel %vm409_vm0, %v503_v41, %v559_v11  ;;  %v573_v15 = vsel %vm409_vm0, %v507_v4, %v1607_v12  ;;  %v2334_v16 = vsel %vm409_vm0, %v511_v10, %v1609_v13 }
 0x203   :  { %1913 = dma.done.wait [#allocation5], 6144 }
 0x204   :  { %1914 = vsyncadd [#allocation5], 4294961152  ;;  %v677_v17 = vpack.c.bf16 %v571_v14, %v571_v14  ;;  %v679_v18 = vpack.c.bf16 %v573_v15, %v573_v15  ;;  %v1841_v19 = vld [vmem:[#allocation2 + $0x78] sm:$0xff]   ;;  %v1845_v23 = vld [vmem:[#allocation2 + $0x70] sm:$0xff]   ;;  %v676_v9 = vpack.c.bf16 %v2322_v6, %v2322_v6  ;;  %v681_v11 = vpack.c.bf16 %v2334_v16, %v2334_v16  ;;  %s1923_s12 = smov 64  }
 0x205   :  { %v1842_v20 = vld [vmem:[#allocation2 + $0x38] sm:$0xff]   ;;  %1702 = vmatprep.subr.bf16.mxu1 %v1841_v19  ;;  %v1846_v24 = vld [vmem:[#allocation2 + $0x30] sm:$0xff]   ;;  %v1849_v27 = vld [vmem:[#allocation2 + $0x68] sm:$0xff]   ;;  %v678_v13 = vpack.c.bf16 %v2325_v7, %v2325_v7  ;;  %vm1097_vm11 = vcmask 523264  }
 0x206   :  { %1003 = vmatprep.mubr.bf16.mxu1 %v677_v17  ;;  %1043 = vmatprep.mubr.bf16.mxu0 %v679_v18  ;;  %v1843_v21 = vld [vmem:[#allocation2 + $0xf8] sm:$0xff]   ;;  %v1847_v25 = vld [vmem:[#allocation2 + $0xf0] sm:$0xff]   ;;  %v1850_v28 = vld [vmem:[#allocation2 + $0x28] sm:$0xff]  }
 0x207   :  { %1703 = vmatpush3.bf16.msra.mxu1 %v1842_v20  ;;  %v1844_v22 = vld [vmem:[#allocation2 + $0xb8] sm:$0xff]   ;;  %1724 = vmatprep.subr.bf16.mxu0 %v1843_v21  ;;  %v1848_v26 = vld [vmem:[#allocation2 + $0xb0] sm:$0xff]   ;;  %v1851_v29 = vld [vmem:[#allocation2 + $0xe8] sm:$0xff]  }
 0x208   :  { %1725 = vmatpush3.bf16.msra.mxu0 %v1844_v22  ;;  %1704 = vmatprep.subr.bf16.mxu1 %v1845_v23  ;;  %v1852_v32 = vld [vmem:[#allocation2 + $0xa8] sm:$0xff]   ;;  %v1853_v34 = vld [vmem:[#allocation2 + $0x60] sm:$0xff]   ;;  %v1857_v38 = vld [vmem:[#allocation2 + $0x58] sm:$0xff]  }
 0x209   :  { %1726 = vmatprep.subr.bf16.mxu0 %v1847_v25  ;;  %v1854_v35 = vld [vmem:[#allocation2 + $0x20] sm:$0xff]   ;;  %v1858_v39 = vld [vmem:[#allocation2 + $0x18] sm:$0xff]   ;;  %v1861_v42 = vld [vmem:[#allocation2 + $0x50] sm:$0xff]  }
 0x20a   :  { %v1855_v36 = vld [vmem:[#allocation2 + $0xe0] sm:$0xff]   ;;  %v1859_v40 = vld [vmem:[#allocation2 + $0xd8] sm:$0xff]   ;;  %v1862_v43 = vld [vmem:[#allocation2 + $0x10] sm:$0xff]  }
 0x20b   :  { %1705 = vmatpush3.bf16.msra.mxu1 %v1846_v24  ;;  %v1856_v37 = vld [vmem:[#allocation2 + $0xa0] sm:$0xff]   ;;  %v1860_v41 = vld [vmem:[#allocation2 + $0x98] sm:$0xff]   ;;  %v1863_v44 = vld [vmem:[#allocation2 + $0xd0] sm:$0xff]  }
 0x20c   :  { %1727 = vmatpush3.bf16.msra.mxu0 %v1848_v26  ;;  %1706 = vmatprep.subr.bf16.mxu1 %v1849_v27  ;;  %v1864_v45 = vld [vmem:[#allocation2 + $0x90] sm:$0xff]   ;;  %v1865_v46 = vld [vmem:[#allocation2 + $0x48] sm:$0xff]   ;;  %v1869_v3 = vld [vmem:[#allocation2 + $0x40] sm:$0xff]   ;;  %v680_v27 = vpack.c.bf16 %v2328_v8, %v2328_v8 }
 0x20d   :  { %1728 = vmatprep.subr.bf16.mxu0 %v1851_v29  ;;  %v1866_v0 = vld [vmem:[#allocation2 + $0x8] sm:$0xff]   ;;  %v1870_v4 = vld [vmem:[#allocation2] sm:$0xff]   ;;  %v1873_v12 = vld [vmem:[#allocation2 + $0x178] sm:$0xff]  }
 0x20e   :  { %v1867_v1 = vld [vmem:[#allocation2 + $0xc8] sm:$0xff]   ;;  %v1871_v5 = vld [vmem:[#allocation2 + $0xc0] sm:$0xff]   ;;  %v1874_v14 = vld [vmem:[#allocation2 + $0x138] sm:$0xff]  }
 0x20f   :  { %1707 = vmatpush3.bf16.msra.mxu1 %v1850_v28  ;;  %v1868_v2 = vld [vmem:[#allocation2 + $0x88] sm:$0xff]   ;;  %v1872_v10 = vld [vmem:[#allocation2 + $0x80] sm:$0xff]   ;;  %v1875_v15 = vld [vmem:[#allocation2 + $0x170] sm:$0xff]  }
 0x210   :  { %1729 = vmatpush3.bf16.msra.mxu0 %v1852_v32  ;;  %1708 = vmatprep.subr.bf16.mxu1 %v1853_v34  ;;  %v1876_v17 = vld [vmem:[#allocation2 + $0x130] sm:$0xff]   ;;  %v1877_v6 = vld [vmem:[#allocation2 + $0x168] sm:$0xff]   ;;  %v1879_v16 = vld [vmem:[#allocation2 + $0x160] sm:$0xff]  }
 0x211   :  { %1730 = vmatprep.subr.bf16.mxu0 %v1855_v36  ;;  %v1878_v18 = vld [vmem:[#allocation2 + $0x128] sm:$0xff]   ;;  %v1880_v19 = vld [vmem:[#allocation2 + $0x120] sm:$0xff]   ;;  %v1881_v20 = vld [vmem:[#allocation2 + $0x158] sm:$0xff]  }
 0x212   :  { %v1882_v7 = vld [vmem:[#allocation2 + $0x118] sm:$0xff]   ;;  %v1883_v21 = vld [vmem:[#allocation2 + $0x150] sm:$0xff]   ;;  %v1885_v23 = vld [vmem:[#allocation2 + $0x148] sm:$0xff]  }
 0x213   :  { %1709 = vmatpush3.bf16.msra.mxu1 %v1854_v35  ;;  %v1884_v22 = vld [vmem:[#allocation2 + $0x110] sm:$0xff]   ;;  %v1886_v24 = vld [vmem:[#allocation2 + $0x108] sm:$0xff]   ;;  %v1887_v25 = vld [vmem:[#allocation2 + $0x140] sm:$0xff]  }
 0x214   :  { %1731 = vmatpush3.bf16.msra.mxu0 %v1856_v37  ;;  %1710 = vmatprep.subr.bf16.mxu1 %v1857_v38  ;;  %v1888_v26 = vld [vmem:[#allocation2 + $0x100] sm:$0xff]  }
 0x215   :  { %1732 = vmatprep.subr.bf16.mxu0 %v1859_v40  ;;  %v682_v40 = vld [vmem:[%s2405_s1 + $0x31] ss:$0 sm:$0xff] }
 0x217   :  { %1711 = vmatpush3.bf16.msra.mxu1 %v1858_v39 }
 0x218   :  { %1733 = vmatpush3.bf16.msra.mxu0 %v1860_v41  ;;  %1712 = vmatprep.subr.bf16.mxu1 %v1861_v42 }
 0x219   :  { %1734 = vmatprep.subr.bf16.mxu0 %v1863_v44 }
 0x21b   :  { %1713 = vmatpush3.bf16.msra.mxu1 %v1862_v43 }
 0x21c   :  { %1735 = vmatpush3.bf16.msra.mxu0 %v1864_v45  ;;  %1714 = vmatprep.subr.bf16.mxu1 %v1865_v46 }
 0x21d   :  { %1736 = vmatprep.subr.bf16.mxu0 %v1867_v1 }
 0x21f   :  { %1715 = vmatpush3.bf16.msra.mxu1 %v1866_v0 }
 0x220   :  { %1737 = vmatpush3.bf16.msra.mxu0 %v1868_v2  ;;  %1716 = vmatprep.subr.bf16.mxu1 %v1869_v3 }
 0x221   :  { %1738 = vmatprep.subr.bf16.mxu0 %v1871_v5 }
 0x223   :  { %1717 = vmatpush3.bf16.msra.mxu1 %v1870_v4 }
 0x224   :  { %1739 = vmatpush3.bf16.msra.mxu0 %v1872_v10  ;;  %1746 = vmatprep.subr.bf16.mxu1 %v1873_v12  ;;  %v1673_v12 = vcombine.low %v2173_v62, %v2178_v63 }
 0x226   :  { %1004 = vmatmul.mubr.bf16.vlgmr.msra.gmra.mxu1 %v676_v9 }
 0x227   :  { %1747 = vmatpush3.bf16.msra.mxu1 %v1874_v14  ;;  %1083 = vmatprep.mubr.bf16.mxu1 %v681_v11  ;;  %v1674_v11 = vcombine.high %v2173_v62, %v2178_v63 }
 0x228   :  { %1044 = vmatmul.mubr.bf16.vlgmr.msra.gmra.mxu0 %v678_v13  ;;  %1748 = vmatprep.subr.bf16.mxu1 %v1875_v15  ;;  %v1672_v13 = vcombine.high %v2163_v60, %v2168_v61 }
 0x229   :  { %1249 = vmatprep.mubr.bf16.mxu0 %v1920_v47 }
 0x22b   :  { %1749 = vmatpush3.bf16.msra.mxu1 %v1876_v17 }
 0x22c   :  { %1750 = vmatprep.subr.bf16.mxu1 %v1877_v6 }
 0x22f   :  { %1751 = vmatpush3.bf16.msra.mxu1 %v1878_v18 }
 0x230   :  { %1752 = vmatprep.subr.bf16.mxu1 %v1879_v16 }
 0x233   :  { %1753 = vmatpush3.bf16.msra.mxu1 %v1880_v19 }
 0x234   :  { %1754 = vmatprep.subr.bf16.mxu1 %v1881_v20 }
 0x237   :  { %1755 = vmatpush3.bf16.msra.mxu1 %v1882_v7 }
 0x238   :  { %1756 = vmatprep.subr.bf16.mxu1 %v1883_v21 }
 0x23b   :  { %1757 = vmatpush3.bf16.msra.mxu1 %v1884_v22 }
 0x23c   :  { %1758 = vmatprep.subr.bf16.mxu1 %v1885_v23 }
 0x23f   :  { %1759 = vmatpush3.bf16.msra.mxu1 %v1886_v24 }
 0x240   :  { %1760 = vmatprep.subr.bf16.mxu1 %v1887_v25 }
 0x243   :  { %1761 = vmatpush3.bf16.msra.mxu1 %v1888_v26 }
 0x246   :  { %1084 = vmatmul.mubr.bf16.vlgmr.msra.gmra.mxu1 %v680_v27 }
 0x2e6   :  { %v1718_v28 = vpop.f32.mrf.mxu1 }
 0x2e8   :  { %v1719_v29 = vpop.f32.mrf.mxu1  ;;  %v1740_v32 = vpop.f32.mrf.mxu0 }
 0x2e9   :  { %v1720_v39 = vadd.f32 %v1719_v29, %v1718_v28 }
 0x2ea   :  { %v1721_v34 = vpop.f32.mrf.mxu1  ;;  %v1741_v35 = vpop.f32.mrf.mxu0 }
 0x2eb   :  { %v1006_v41 = vadd.f32 %v1720_v39, %v682_v40  ;;  %v1742_v42 = vadd.f32 %v1741_v35, %v1740_v32 }
 0x2ec   :  { %v1722_v36 = vpop.f32.mrf.mxu1  ;;  %v1743_v37 = vpop.f32.mrf.mxu0 }
 0x2ed   :  { %v1046_v8 = vadd.f32 %v1742_v42, %v1006_v41 }
 0x2ee   :  { %v1744_v38 = vpop.f32.mrf.mxu0 }
 0x306   :  { %v1762_v43 = vpop.f32.mrf.mxu1 }
 0x308   :  { %v1763_v44 = vpop.f32.mrf.mxu1 }
 0x309   :  { %v1764_v45 = vadd.f32 %v1763_v44, %v1762_v43 }
 0x30a   :  { %v1765_v46 = vpop.f32.mrf.mxu1 }
 0x30b   :  { %v1086_v0 = vadd.f32 %v1764_v45, %v1046_v8 }
 0x30c   :  { %v1766_v1 = vpop.f32.mrf.mxu1 }
 0x30d   :  { %v1091_v2 = vmax.f32 %v1086_v0, 0.0 }
 0x30f   :  { %v1093_v3 = vrot.slane %v1091_v2, 2 }
 0x311   :  { %1094 = vrot.lane.b32.xlu0 %v1093_v3, %s1923_s12 }
 0x383   :  { %v1095_v4 = vpop.permute.xlu0 %1094 }
 0x384   :  { %v1098_v5 = vsel %vm1097_vm11, %v1091_v2, %v1095_v4 }
 0x385   :  { %v1100_v9 = vrot.slane %v1098_v5, 3 }
 0x387   :  { %v1102_v10 = vsel %vm328_vm2, %v1098_v5, %v1100_v9 }
 0x388   :  { %1915 = dma.done.wait [#allocation5 + $0x1], 2048 }
 0x389   :  { %1916 = vsyncadd [#allocation5 + $0x1], 4294965248  ;;  %1217 = vmatprep.subr.bf16.mxu0 %v1674_v11  ;;  %v1671_v14 = vcombine.low %v2163_v60, %v2168_v61  ;;  %v1670_v15 = vcombine.high %v2153_v58, %v2158_v59  ;;  %v1669_v62 = vcombine.low %v2153_v58, %v2158_v59  ;;  %v1668_v63 = vcombine.high %v2143_v56, %v2148_v57 }
 0x38a   :  { %1218 = vmatpush1.bf16.msra.mxu0 %v1673_v12  ;;  %v1667_v47 = vcombine.low %v2143_v56, %v2148_v57  ;;  %v1666_v60 = vcombine.high %v2133_v54, %v2138_v55  ;;  %v1665_v61 = vcombine.low %v2133_v54, %v2138_v55  ;;  %v1664_v58 = vcombine.high %v2123_v52, %v2128_v53 }
 0x38b   :  { %1219 = vmatprep.subr.bf16.mxu0 %v1672_v13  ;;  %v1663_v59 = vcombine.low %v2123_v52, %v2128_v53  ;;  %v1662_v56 = vcombine.high %v2113_v50, %v2118_v51  ;;  %v1661_v57 = vcombine.low %v2113_v50, %v2118_v51  ;;  %v1660_v54 = vcombine.high %v2103_v48, %v2108_v49  ;;  %v1658_v52 = vld [vmem:[%s2405_s1 + $0x32] ss:$8 sm:$0x3] }
 0x38c   :  { %v1659_v55 = vcombine.low %v2103_v48, %v2108_v49  ;;  %v1123_v17 = vpack.c.bf16 %v1102_v10, %v1102_v10  ;;  %v1130_v53 = vrot.slane %v1658_v52, %v397_v31  ;;  %v1134_v50 = vrot.slane %v1658_v52, %v401_v33 }
 0x38e   :  { %1220 = vmatpush1.bf16.msra.mxu0 %v1671_v14 }
 0x38f   :  { %1221 = vmatprep.subr.bf16.mxu0 %v1670_v15 }
 0x392   :  { %1222 = vmatpush1.bf16.msra.mxu0 %v1669_v62 }
 0x393   :  { %1223 = vmatprep.subr.bf16.mxu0 %v1668_v63 }
 0x396   :  { %1224 = vmatpush1.bf16.msra.mxu0 %v1667_v47 }
 0x397   :  { %1225 = vmatprep.subr.bf16.mxu0 %v1666_v60 }
 0x39a   :  { %1226 = vmatpush1.bf16.msra.mxu0 %v1665_v61 }
 0x39b   :  { %1227 = vmatprep.subr.bf16.mxu0 %v1664_v58 }
 0x39e   :  { %1228 = vmatpush1.bf16.msra.mxu0 %v1663_v59 }
 0x39f   :  { %1229 = vmatprep.subr.bf16.mxu0 %v1662_v56 }
 0x3a2   :  { %1230 = vmatpush1.bf16.msra.mxu0 %v1661_v57 }
 0x3a3   :  { %1231 = vmatprep.subr.bf16.mxu0 %v1660_v54 }
 0x3a6   :  { %1232 = vmatpush1.bf16.msra.mxu0 %v1659_v55 }
 0x3a9   :  { %1250 = vmatmul.mubr.bf16.vlgmr.msra.gmra.mxu0 %v1123_v17 }
 0x469   :  { %v1251_v51 = vpop.f32.mrf.mxu0 }
 0x46a   :  { %v1252_v6 = vadd.f32 %v1251_v51, %v1130_v53 }
 0x46b   :  { %v1253_v18 = vpop.f32.mrf.mxu0 }
 0x46c   :  { %v1258_v16 = vmax.f32 %v1252_v6, 0.0  ;;  %v1254_v19 = vadd.f32 %v1253_v18, %v1134_v50 }
 0x46d   :  { %v1255_v48 = vpop.f32.mrf.mxu0 }
 0x46e   :  { %v1259_v49 = vmax.f32 %v1254_v19, 0.0 }
 0x46f   :  { %v1256_v20 = vpop.f32.mrf.mxu0 }
 0x470   :  { %1917 = dma.done.wait [#allocation5 + $0x2], 3072 }
 0x471   :  { %1918 = vsyncadd [#allocation5 + $0x2], 4294964224  ;;  %v1297_v7 = vpack.c.bf16 %v1259_v49, %v1259_v49  ;;  %v1924_v21 = vmov 0.0   ;;  %v1889_v22 = vld [vmem:[#allocation4 + $0x78] sm:$0xff]   ;;  %v1891_v31 = vld [vmem:[#allocation4 + $0x70] sm:$0xff]   ;;  %v1296_v42 = vpack.c.bf16 %v1258_v16, %v1258_v16  ;;  %vm1925_vm12 = vmmov 0  }
 0x472   :  { %1799 = vmatprep.subr.bf16.mxu0 %v1924_v21  ;;  %v1890_v23 = vld [vmem:[#allocation4 + $0x38] sm:$0xff]   ;;  %1768 = vmatprep.subr.bf16.mxu1 %v1889_v22  ;;  %v1892_v30 = vld [vmem:[#allocation4 + $0x30] sm:$0xff]   ;;  %v1893_v33 = vld [vmem:[#allocation4 + $0x68] sm:$0xff]   ;;  %vm1550_vm13 = vcmask 1024  }
 0x473   :  { %1427 = vmatprep.mubr.bf16.mxu1 %v1297_v7  ;;  %1769 = vmatpush3.bf16.msra.mxu1 %v1890_v23  ;;  %v1894_v24 = vld [vmem:[#allocation4 + $0x28] sm:$0xff]   ;;  %v1895_v25 = vld [vmem:[#allocation4 + $0x60] sm:$0xff]   ;;  %v1897_v27 = vld [vmem:[#allocation4 + $0x58] sm:$0xff]  }
 0x474   :  { %1770 = vmatprep.subr.bf16.mxu1 %v1891_v31  ;;  %v1896_v26 = vld [vmem:[#allocation4 + $0x20] sm:$0xff]   ;;  %v1898_v28 = vld [vmem:[#allocation4 + $0x18] sm:$0xff]   ;;  %v1899_v29 = vld [vmem:[#allocation4 + $0x50] sm:$0xff]   ;;  %1815 = vmatprep.mubr.msk.bf16.mxu0 %vm1925_vm12, %v1924_v21 }
 0x475   :  { %v1905_v32 = vld [vmem:[#allocation4 + $0xb8] sm:$0xff]   ;;  %v1900_v34 = vld [vmem:[#allocation4 + $0x10] sm:$0xff]   ;;  %v1901_v36 = vld [vmem:[#allocation4 + $0x48] sm:$0xff]  }
 0x476   :  { %1800 = vmatpush3.bf16.msra.mxu0 %v1905_v32  ;;  %v1906_v35 = vld [vmem:[#allocation4 + $0xb0] sm:$0xff]   ;;  %v1907_v37 = vld [vmem:[#allocation4 + $0xa8] sm:$0xff]   ;;  %v1903_v39 = vld [vmem:[#allocation4 + $0x40] sm:$0xff]  }
 0x477   :  { %1771 = vmatpush3.bf16.msra.mxu1 %v1892_v30  ;;  %1801 = vmatprep.subr.bf16.mxu0 %v1924_v21  ;;  %v1902_v38 = vld [vmem:[#allocation4 + $0x8] sm:$0xff]   ;;  %v1908_v40 = vld [vmem:[#allocation4 + $0xa0] sm:$0xff]   ;;  %v1909_v43 = vld [vmem:[#allocation4 + $0x98] sm:$0xff]  }
 0x478   :  { %1772 = vmatprep.subr.bf16.mxu1 %v1893_v33  ;;  %v1904_v41 = vld [vmem:[#allocation4] sm:$0xff]   ;;  %v1910_v44 = vld [vmem:[#allocation4 + $0x90] sm:$0xff]   ;;  %v1911_v8 = vld [vmem:[#allocation4 + $0x88] sm:$0xff]  }
 0x479   :  { %v1912_v45 = vld [vmem:[#allocation4 + $0x80] sm:$0xff]   ;;  %v1298_v0 = vld [vmem:[%s2405_s1 + $0x33] ss:$0 sm:$0xff]  ;;  %v1453_v11 = vld [vmem:[%s2405_s1 + $0x34] ss:$0 sm:$0xff] }
 0x47a   :  { %1802 = vmatpush3.bf16.msra.mxu0 %v1906_v35  ;;  %v1543_v15 = vld [vmem:[%s2405_s1 + $0x35] ss:$0 sm:$0xff]  ;;  %v1548_v58 = vld [vmem:[%s2405_s1 + $0x36] ss:$0 sm:$0xff] }
 0x47b   :  { %1773 = vmatpush3.bf16.msra.mxu1 %v1894_v24  ;;  %1803 = vmatprep.subr.bf16.mxu0 %v1924_v21 }
 0x47c   :  { %1774 = vmatprep.subr.bf16.mxu1 %v1895_v25 }
 0x47e   :  { %1804 = vmatpush3.bf16.msra.mxu0 %v1907_v37 }
 0x47f   :  { %1775 = vmatpush3.bf16.msra.mxu1 %v1896_v26  ;;  %1805 = vmatprep.subr.bf16.mxu0 %v1924_v21 }
 0x480   :  { %1776 = vmatprep.subr.bf16.mxu1 %v1897_v27 }
 0x482   :  { %1806 = vmatpush3.bf16.msra.mxu0 %v1908_v40 }
 0x483   :  { %1777 = vmatpush3.bf16.msra.mxu1 %v1898_v28  ;;  %1807 = vmatprep.subr.bf16.mxu0 %v1924_v21 }
 0x484   :  { %1778 = vmatprep.subr.bf16.mxu1 %v1899_v29 }
 0x486   :  { %1808 = vmatpush3.bf16.msra.mxu0 %v1909_v43 }
 0x487   :  { %1779 = vmatpush3.bf16.msra.mxu1 %v1900_v34  ;;  %1809 = vmatprep.subr.bf16.mxu0 %v1924_v21 }
 0x488   :  { %1780 = vmatprep.subr.bf16.mxu1 %v1901_v36 }
 0x48a   :  { %1810 = vmatpush3.bf16.msra.mxu0 %v1910_v44 }
 0x48b   :  { %1781 = vmatpush3.bf16.msra.mxu1 %v1902_v38  ;;  %1811 = vmatprep.subr.bf16.mxu0 %v1924_v21 }
 0x48c   :  { %1782 = vmatprep.subr.bf16.mxu1 %v1903_v39 }
 0x48e   :  { %1812 = vmatpush3.bf16.msra.mxu0 %v1911_v8 }
 0x48f   :  { %1783 = vmatpush3.bf16.msra.mxu1 %v1904_v41  ;;  %1813 = vmatprep.subr.bf16.mxu0 %v1924_v21 }
 0x492   :  { %1428 = vmatmul.mubr.bf16.vlgmr.msra.gmra.mxu1 %v1296_v42  ;;  %1814 = vmatpush3.bf16.msra.mxu0 %v1912_v45 }
 0x552   :  { %v1784_v46 = vpop.f32.mrf.mxu1 }
 0x554   :  { %v1785_v1 = vpop.f32.mrf.mxu1 }
 0x555   :  { %v1786_v2 = vadd.f32 %v1785_v1, %v1784_v46 }
 0x556   :  { %v1787_v3 = vpop.f32.mrf.mxu1 }
 0x557   :  { %v1430_v4 = vadd.f32 %v1786_v2, %v1298_v0 }
 0x558   :  { %v1788_v5 = vpop.f32.mrf.mxu1 }
 0x559   :  { %v1435_v9 = vmax.f32 %v1430_v4, 0.0 }
 0x55b   :  { %v1452_v10 = vpack.c.bf16 %v1435_v9, %v1435_v9 }
 0x55d   :  { %1816 = vmatmul.mubr.bf16.vlgmr.msra.gmra.mxu0 %v1452_v10 }
 0x61d   :  { %v1536_v12 = vpop.f32.mrf.mxu0 }
 0x61e   :  { %v1537_v13 = vadd.f32 %v1536_v12, %v1453_v11 }
 0x61f   :  { %v1817_v14 = vpop.f32.mrf.mxu0 }
 0x620   :  { %v1542_v62 = vmax.f32 %v1537_v13, 0.0 }
 0x621   :  { %v1539_v63 = vpop.f32.mrf.mxu0 }
 0x622   :  { %v1544_v47 = vmul.f32 %v1543_v15, %v1542_v62 }
 0x623   :  { %v1818_v60 = vpop.f32.mrf.mxu0 }
 0x624   :  { %v1545_v61 = vsel %vm487_vm8, %v1544_v47, 0.0 }
 0x625   :  { %1546 = vadd.xlane.f32.xlu0 %v1545_v61 }
 0x6ae   :  { %v1547_v59 = vpop.xlane.xlu0 %1546 }
 0x6af   :  { %v1549_v56 = vadd.f32 %v1548_v58, %v1547_v59 }
 0x6b1   :  { %1551 = vst.msk [vmem:[%s2409_s5] sm:$0x3] %vm1550_vm13, %v1549_v56 }
 0x6b2   :  { %1556 = vsyncmov [#allocation5] }
 0x6b5   :  { %s1557_s23 = vpop.sfrf %1556 }
 0x6b6   :  { %p1699_p0 = scmp.ne.s32.totalorder %s1557_s23, 0 }
 0x6b8   :  { %1561 = shalt.err (%p1699_p0)  }
 0x6b9   :  { %1563 = vsyncmov [#allocation5 + $0x1] }
 0x6bc   :  { %s1564_s24 = vpop.sfrf %1563 }
 0x6bd   :  { %p1700_p1 = scmp.ne.s32.totalorder %s1564_s24, 0 }
 0x6bf   :  { %1568 = shalt.err (%p1700_p1)  }
 0x6c0   :  { %1570 = vsyncmov [#allocation5 + $0x2] }
 0x6c3   :  { %s1571_s25 = vpop.sfrf %1570 }
 0x6c4   :  { %p1701_p2 = scmp.ne.s32.totalorder %s1571_s25, 0 }
 0x6c6   :  { %1575 = shalt.err (%p1701_p2)  }

</bundles_post_ra>
